<compile_context>
chip_gen: v7x
topology: tpu7x:2x2x1
jax: 0.10.0
libtpu: 0.0.40
codegen_flags: <defaults>
</compile_context>

<pallas_src>
import functools

import jax
import jax.numpy as jnp
from jax.experimental import pallas as pl
from jax.experimental.pallas import tpu as pltpu

_IN, _HID, _OUT = 32, 64, 8

# Per-generation budgets.
_V7X_SAFE = dict(tile_cap=8192, vmem_limit=40 * 1024 * 1024)   # 64 MiB VMEM parts
_BIG_VMEM = dict(tile_cap=16384, vmem_limit=64 * 1024 * 1024)  # 128 MiB VMEM parts
_SINGLE_BLOCK_MAX = 1024   # below this, one full-array block (no padding waste)
_ROW_GRANULE = 512         # tile-row granule (multiple of 8 sublanes)


@functools.lru_cache(maxsize=None)
def _chip_config():
    """Pick tile cap / VMEM limit from the physical VMEM capacity."""
    try:
        cap_bytes = pltpu.get_tpu_info().vmem_capacity_bytes
    except Exception:
        return _V7X_SAFE                       # conservative: safe on every gen
    return _BIG_VMEM if cap_bytes >= 96 * 1024 * 1024 else _V7X_SAFE


def _mlp_kernel(x_ref, w1_ref, b1_ref, w2_ref, b2_ref, o_ref):
    # Layer 1: (TB,32) @ (32,64) + (1,64) -> ReLU   (f32 accumulation on MXU).
    h = jnp.dot(x_ref[...], w1_ref[...], preferred_element_type=jnp.float32)
    h = jnp.maximum(h + b1_ref[...], 0.0)
    # Stage h in bf16: halves the (TB,64) VMEM round-trip store/load op count
    # (store slot is the binding unit on v5e/v7x); MXU is bf16-native.
    h = h.astype(jnp.bfloat16)
    # Layer 2: (TB,64) @ (64,8) + (1,8) -> ReLU.
    y = jnp.dot(h, w2_ref[...].astype(jnp.bfloat16),
                preferred_element_type=jnp.float32)
    y = jnp.maximum(y + b2_ref[...], 0.0)
    o_ref[...] = y.astype(o_ref.dtype)


def _round_up(n, m):
    return ((n + m - 1) // m) * m


def variational_regressor(x, w1, b1, w2, b2, *, tile_rows=None):
    """x: (B, 32) f32 -> (B, 8) f32.  Weights pre-transposed to (in, out)."""
    B = x.shape[0]
    b1 = b1.reshape(1, _HID).astype(jnp.float32)
    b2 = b2.reshape(1, _OUT).astype(jnp.float32)

    cfg = _chip_config()
    cap = cfg["tile_cap"] if tile_rows is None else int(tile_rows)

    if B <= _SINGLE_BLOCK_MAX:
        # Single full-array block (block shape == array shape is always legal).
        tb, b_pad = B, B
    else:
        # Aim for >=2 balanced grid steps (so the "parallel" batch axis can be
        # sharded across v7x's two TensorCores), tiles as big as the
        # per-generation cap allows to amortize the ~0.35 us per-step cost.
        tb = min(cap, _round_up(-(-B // 2), _ROW_GRANULE))
        b_pad = _round_up(B, tb)
        if b_pad != B:
            x = jnp.pad(x, ((0, b_pad - B), (0, 0)))

    grid = (b_pad // tb,)
    cost = pl.CostEstimate(
        flops=2 * b_pad * (_IN * _HID + _HID * _OUT),
        transcendentals=0,
        bytes_accessed=4 * (b_pad * (_IN + _OUT)
                            + _IN * _HID + _HID + _HID * _OUT + _OUT),
    )

    out = pl.pallas_call(
        _mlp_kernel,
        out_shape=jax.ShapeDtypeStruct((b_pad, _OUT), jnp.float32),
        grid_spec=pltpu.PrefetchScalarGridSpec(
            num_scalar_prefetch=0,
            grid=grid,
            in_specs=[
                pl.BlockSpec((tb, _IN), lambda i: (i, 0)),         # x tile (streamed)
                pl.BlockSpec((_IN, _HID), lambda i: (0, 0)),       # w1 (VMEM-resident)
                pl.BlockSpec((1, _HID), lambda i: (0, 0)),         # b1 (VMEM-resident)
                pl.BlockSpec((_HID, _OUT), lambda i: (0, 0)),      # w2 (VMEM-resident)
                pl.BlockSpec((1, _OUT), lambda i: (0, 0)),         # b2 (VMEM-resident)
            ],
            out_specs=pl.BlockSpec((tb, _OUT), lambda i: (i, 0)),  # out tile (streamed)
        ),
        compiler_params=pltpu.CompilerParams(
            dimension_semantics=("parallel",),     # v7x: shard batch over both TCs
            vmem_limit_bytes=cfg["vmem_limit"],    # per-generation budget
        ),
        cost_estimate=cost,
    )(x, w1, b1, w2, b2)
    return out[:B]


def init_params(key):
    """Deterministic synthetic parameters matching nn.Linear(32,64), nn.Linear(64,8)."""
    k1, k2, k3, k4 = jax.random.split(key, 4)
    # PyTorch Linear stores weight as (out, in); we keep (in, out) for x @ W.
    lim1 = 1.0 / jnp.sqrt(32.0)
    w1 = jax.random.uniform(k1, (32, 64), jnp.float32, -lim1, lim1)
    b1 = jax.random.uniform(k2, (1, 64), jnp.float32, -lim1, lim1)
    lim2 = 1.0 / jnp.sqrt(64.0)
    w2 = jax.random.uniform(k3, (64, 8), jnp.float32, -lim2, lim2)
    b2 = jax.random.uniform(k4, (1, 8), jnp.float32, -lim2, lim2)
    return w1, b1, w2, b2


def _reference_f32(x, w1, b1, w2, b2):
    h = jnp.maximum(x @ w1 + b1.reshape(1, -1), 0.0)
    return jnp.maximum(h @ w2 + b2.reshape(1, -1), 0.0)


def _reference_bf16h(x, w1, b1, w2, b2):
    # Matches the kernel's numerics: f32 layer 1, bf16 h / W2, f32 accumulation.
    h = jnp.maximum(x @ w1 + b1.reshape(1, -1), 0.0).astype(jnp.bfloat16)
    y = jnp.dot(h, w2.astype(jnp.bfloat16), preferred_element_type=jnp.float32)
    return jnp.maximum(y + b2.reshape(1, -1), 0.0)


if __name__ == "__main__":
    key = jax.random.PRNGKey(0)
    kx, kp = jax.random.split(key)
    w1, b1, w2, b2 = init_params(kp)

    # Small single-tile case (the module's nominal usage).
    B = 2
    x = jax.random.normal(kx, (B, _IN), jnp.float32)
    out = jax.block_until_ready(variational_regressor(x, w1, b1, w2, b2))
    assert out.shape == (B, _OUT)
    assert jnp.allclose(out, _reference_bf16h(x, w1, b1, w2, b2), atol=1e-4, rtol=1e-4)
    assert jnp.allclose(out, _reference_f32(x, w1, b1, w2, b2), atol=2e-2, rtol=2e-2)

    # Multi-tile case: exercises the batch grid (>=2 steps), double buffering
    # and tail padding.
    B2 = 4100
    x2 = jax.random.normal(kx, (B2, _IN), jnp.float32)
    out2 = jax.block_until_ready(variational_regressor(x2, w1, b1, w2, b2))
    assert out2.shape == (B2, _OUT)
    assert jnp.allclose(out2, _reference_bf16h(x2, w1, b1, w2, b2), atol=1e-4, rtol=1e-4)
    assert jnp.allclose(out2, _reference_f32(x2, w1, b1, w2, b2), atol=2e-2, rtol=2e-2)

    print("KERNEL_OK")
</pallas_src>

<mosaic_0001>
module attributes {stable_mosaic.version = 11 : i64} {
  func.func @_mlp_kernel(%arg0: i32, %arg1: memref<2x32xf32, #tpu.memory_space<vmem>>, %arg2: memref<32x64xf32, #tpu.memory_space<vmem>>, %arg3: memref<1x64xf32, #tpu.memory_space<vmem>>, %arg4: memref<64x8xf32, #tpu.memory_space<vmem>>, %arg5: memref<1x8xf32, #tpu.memory_space<vmem>>, %arg6: memref<2x8xf32, #tpu.memory_space<vmem>>) attributes {dimension_semantics = [#tpu.dimension_semantics<parallel>], iteration_bounds = array<i64: 1>, scalar_prefetch = 0 : i64, scratch_operands = 0 : i64, tpu.core_type = #tpu.core_type<tc>, window_params = [{transform_indices = @transform_0, window_bounds = array<i64: 2, 32>}, {pipeline_mode = #tpu.pipeline_mode<synchronous>, transform_indices = @transform_1, window_bounds = array<i64: 32, 64>}, {pipeline_mode = #tpu.pipeline_mode<synchronous>, transform_indices = @transform_2, window_bounds = array<i64: 1, 64>}, {pipeline_mode = #tpu.pipeline_mode<synchronous>, transform_indices = @transform_3, window_bounds = array<i64: 64, 8>}, {pipeline_mode = #tpu.pipeline_mode<synchronous>, transform_indices = @transform_4, window_bounds = array<i64: 1, 8>}, {transform_indices = @transform_5, window_bounds = array<i64: 2, 8>}]} {
    %c0 = arith.constant 0 : index
    %c0_0 = arith.constant 0 : index
    %0 = vector.load %arg1[%c0, %c0_0] : memref<2x32xf32, #tpu.memory_space<vmem>>, vector<2x32xf32>
    %c0_1 = arith.constant 0 : index
    %c0_2 = arith.constant 0 : index
    %1 = vector.load %arg2[%c0_1, %c0_2] : memref<32x64xf32, #tpu.memory_space<vmem>>, vector<32x64xf32>
    %cst = arith.constant dense<0.000000e+00> : vector<2x64xf32>
    %2 = tpu.matmul %0, %1, %cst {dimension_numbers = #tpu.dot_dimension_numbers<[1], [0], [0], [1], [0, 0, 1, 1], [], []>} : vector<2x32xf32>, vector<32x64xf32>, vector<2x64xf32> -> vector<2x64xf32>
    %c0_3 = arith.constant 0 : index
    %c0_4 = arith.constant 0 : index
    %3 = vector.load %arg3[%c0_3, %c0_4] : memref<1x64xf32, #tpu.memory_space<vmem>>, vector<1x64xf32>
    %4 = vector.broadcast %3 : vector<1x64xf32> to vector<2x64xf32>
    %5 = arith.addf %2, %4 : vector<2x64xf32>
    %cst_5 = arith.constant 0.000000e+00 : f32
    %6 = vector.broadcast %cst_5 : f32 to vector<2x64xf32>
    %7 = arith.maximumf %5, %6 : vector<2x64xf32>
    %8 = arith.truncf %7 : vector<2x64xf32> to vector<2x64xbf16>
    %c0_6 = arith.constant 0 : index
    %c0_7 = arith.constant 0 : index
    %9 = vector.load %arg4[%c0_6, %c0_7] : memref<64x8xf32, #tpu.memory_space<vmem>>, vector<64x8xf32>
    %10 = arith.truncf %9 : vector<64x8xf32> to vector<64x8xbf16>
    %cst_8 = arith.constant dense<0.000000e+00> : vector<2x8xf32>
    %11 = tpu.matmul %8, %10, %cst_8 {dimension_numbers = #tpu.dot_dimension_numbers<[1], [0], [0], [1], [0, 0, 1, 1], [], []>} : vector<2x64xbf16>, vector<64x8xbf16>, vector<2x8xf32> -> vector<2x8xf32>
    %c0_9 = arith.constant 0 : index
    %c0_10 = arith.constant 0 : index
    %12 = vector.load %arg5[%c0_9, %c0_10] : memref<1x8xf32, #tpu.memory_space<vmem>>, vector<1x8xf32>
    %13 = vector.broadcast %12 : vector<1x8xf32> to vector<2x8xf32>
    %14 = arith.addf %11, %13 : vector<2x8xf32>
    %cst_11 = arith.constant 0.000000e+00 : f32
    %15 = vector.broadcast %cst_11 : f32 to vector<2x8xf32>
    %16 = arith.maximumf %14, %15 : vector<2x8xf32>
    %c0_12 = arith.constant 0 : index
    %c0_13 = arith.constant 0 : index
    %17 = vector.load %arg6[%c0_12, %c0_13] : memref<2x8xf32, #tpu.memory_space<vmem>>, vector<2x8xf32>
    tpu.vector_store %arg6[%c0_12, %c0_13], %16 {strides = array<i32>} : memref<2x8xf32, #tpu.memory_space<vmem>>, vector<2x8xf32>,
    return
  }
  func.func @transform_0(%arg0: i32) -> (i32, i32) {
    %c0_i32 = arith.constant 0 : i32
    %c0_i32_0 = arith.constant 0 : i32
    return %arg0, %c0_i32 : i32, i32
  }
  func.func @transform_1(%arg0: i32) -> (i32, i32) {
    %c0_i32 = arith.constant 0 : i32
    %c0_i32_0 = arith.constant 0 : i32
    %c0_i32_1 = arith.constant 0 : i32
    return %c0_i32, %c0_i32_0 : i32, i32
  }
  func.func @transform_2(%arg0: i32) -> (i32, i32) {
    %c0_i32 = arith.constant 0 : i32
    %c0_i32_0 = arith.constant 0 : i32
    %c0_i32_1 = arith.constant 0 : i32
    return %c0_i32, %c0_i32_0 : i32, i32
  }
  func.func @transform_3(%arg0: i32) -> (i32, i32) {
    %c0_i32 = arith.constant 0 : i32
    %c0_i32_0 = arith.constant 0 : i32
    %c0_i32_1 = arith.constant 0 : i32
    return %c0_i32, %c0_i32_0 : i32, i32
  }
  func.func @transform_4(%arg0: i32) -> (i32, i32) {
    %c0_i32 = arith.constant 0 : i32
    %c0_i32_0 = arith.constant 0 : i32
    %c0_i32_1 = arith.constant 0 : i32
    return %c0_i32, %c0_i32_0 : i32, i32
  }
  func.func @transform_5(%arg0: i32) -> (i32, i32) {
    %c0_i32 = arith.constant 0 : i32
    %c0_i32_0 = arith.constant 0 : i32
    return %arg0, %c0_i32 : i32, i32
  }
}

</mosaic_0001>

<bundles_post_ra>
// kernel: tpu_custom_call.1
= control target key start
LH: loop header
LB: loop body
LE: loop exit
PB: predicated region body
PF: predicated region fallthrough
CT: control target
= control target key end

     0   :  { %v261_v3 = vmov 0.0|0.0   ;;  %vm262_vm0 = vmmov 0   ;;  %v263_v6 = vmov 0.0   ;;  %s352_s0 = inlined_call_operand.vmem [shape: f32[2,32], index: 0, kind: input, shape index: {}]   ;;  %s353_s1 = inlined_call_operand.vmem [shape: f32[32,64], index: 1, kind: input, shape index: {}]   ;;  %s354_s2 = inlined_call_operand.vmem [shape: f32[1,64], index: 2, kind: input, shape index: {}]   ;;  %s355_s3 = inlined_call_operand.vmem [shape: f32[64,8], index: 3, kind: input, shape index: {}]   ;;  %s356_s4 = inlined_call_operand.vmem [shape: f32[1,8], index: 4, kind: input, shape index: {}]   ;;  %s357_s5 = inlined_call_operand.hbm [shape: f32[2,8], index: 5, kind: output, shape index: {}]  }
   0x1   :  { %v23_v0 = vld [vmem:[%s353_s1] sm:$0xff]  ;;  %v24_v1 = vld [vmem:[%s353_s1 + $0x8] sm:$0xff]  ;;  %v25_v2 = vld [vmem:[%s353_s1 + $0x10] sm:$0xff]  ;;  %227 = vmatprep.subr.bf16.mxu0 %v261_v3  ;;  %212 = vmatprep.mubr.msk.f32.mxu0 %vm262_vm0, %v263_v6 }
   0x2   :  { %v228_v4 = vpack.c.bf16 %v24_v1, %v23_v0  ;;  %v26_v5 = vld [vmem:[%s353_s1 + $0x18] sm:$0xff]  ;;  %v110_v7 = vld [vmem:[%s355_s3] sm:$0xff]  ;;  %215 = vmatprep.subr.bf16.mxu1 %v263_v6  ;;  %v111_v8 = vld [vmem:[%s355_s3 + $0x8] sm:$0xff]  ;;  %223 = vmatprep.mubr.msk.bf16.mxu1 %vm262_vm0, %v263_v6 }
   0x3   :  { %v112_v9 = vld [vmem:[%s355_s3 + $0x10] sm:$0xff]  ;;  %v113_v10 = vld [vmem:[%s355_s3 + $0x18] sm:$0xff]  ;;  %v231_v11 = vpack.c.bf16 %v26_v5, %v25_v2  ;;  %v118_v12 = vpack.c.bf16 %v111_v8, %v110_v7 }
   0x4   :  { %229 = vmatpush3.bf16.msra.mxu0 %v228_v4 }
   0x5   :  { %10 = vsyncpa [#allocation3], 0  ;;  %230 = vmatprep.subr.bf16.mxu0 %v261_v3  ;;  %216 = vmatpush3.bf16.msra.mxu1 %v118_v12  ;;  %v119_v13 = vpack.c.bf16 %v113_v10, %v112_v9  ;;  %v22_v14 = vld [vmem:[%s352_s0] sm:$0x3]  ;;  %vm34_vm1 = vcmask 261120   ;;  %v115_v16 = vld [vmem:[%s355_s3 + $0x28] sm:$0xff] }
   0x6   :  { %217 = vmatprep.subr.bf16.mxu1 %v263_v6  ;;  %v114_v15 = vld [vmem:[%s355_s3 + $0x20] sm:$0xff]  ;;  %v116_v18 = vld [vmem:[%s355_s3 + $0x30] sm:$0xff]  ;;  %v117_v19 = vld [vmem:[%s355_s3 + $0x38] sm:$0xff]  ;;  %vm129_vm2 = vcmask 523264   ;;  %s264_s21 = smov [#allocation2]   ;;  %vm174_vm3 = vcmask 58368  }
   0x7   :  { %v120_v17 = vpack.c.bf16 %v115_v16, %v114_v15  ;;  %v121_v20 = vpack.c.bf16 %v117_v19, %v116_v18  ;;  %v190_v21 = vld [vmem:[%s354_s2] ss:$0 sm:$0xff]  ;;  %s182_s3 = sshll.u32 %s264_s21, 4  ;;  %s183_s3 = int_to_ptr.vmem [resolvable:$true] %s182_s3 }
   0x8   :  { %232 = vmatpush3.bf16.msra.mxu0 %v231_v11  ;;  %v192_v27 = vld [vmem:[%s356_s4] ss:$0 sm:$0xff]  ;;  %s237_s2 = scalar_lea.vmem %s183_s3, 32  ;;  %p242_p1 = scmp.lt.s32.totalorder %s183_s3, %s183_s3 }
   0x9   :  { %218 = vmatpush3.bf16.msra.mxu1 %v119_v13  ;;  %p238_p0 = scmp.ne.s32.totalorder %s183_s3, %s237_s2  ;;  %p243_p2 = scmp.lt.s32.totalorder %s237_s2, %s237_s2 }
   0xa   :  { %219 = vmatprep.subr.bf16.mxu1 %v263_v6 }
   0xb   :  { %213 = vmatmul.mubr.msk.f32.vlgmr.msra.gmra.mrb[0].mxu0 %vm34_vm1, %v22_v14  ;;  %p244_p3 = por %p243_p2, %p242_p1 }
   0xd   :  { %220 = vmatpush3.bf16.msra.mxu1 %v120_v17  ;;  %p245_p4 = pnand %p244_p3, %p238_p0 }
   0xe   :  { %221 = vmatprep.subr.bf16.mxu1 %v263_v6 }
  0x11   :  { %222 = vmatpush3.bf16.msra.mxu1 %v121_v20 }
  0xde   :  { %v104_v22 = vpop.f32.mrb[0].mxu0 }
  0xdf   :  { %v105_v23 = vadd.f32 %v190_v21, %v104_v22  ;;  %v214_v24 = vpop.f32.mrb[1].mxu0 }
  0xe1   :  { %v108_v25 = vmax.f32 %v105_v23, 0.0 }
  0xe3   :  { %v109_v26 = vpack.c.bf16 %v108_v25, %v108_v25 }
  0xe5   :  { %224 = vmatmul.mubr.msk.bf16.vlgmr.msra.gmra.mrb[0].mxu1 %vm129_vm2, %v109_v26 }
 0x1b8   :  { %v167_v28 = vpop.f32.mrb[0].mxu1 }
 0x1b9   :  { %v168_v29 = vadd.f32 %v192_v27, %v167_v28  ;;  %v225_v30 = vpop.f32.mrb[1].mxu1 }
 0x1ba   :  { %v170_v31 = vpop.f32.mrb[2].mxu1 }
 0x1bb   :  { %v173_v32 = vmax.f32 %v168_v29, 0.0  ;;  %v226_v33 = vpop.f32.mrb[3].mxu1 }
 0x1bd   :  { %175 = vst.msk [vmem:[#allocation2] sm:$0x3] %vm174_vm3, %v173_v32 }
 0x1be   :  { %248 = shalt.err (!%p245_p4)
}
 0x1bf   :  { %s249_s23 = scalar_lea.hbm %s357_s5, 32 }
 0x1c0   :  { %p250_p5 = scmp.ne.s32.totalorder %s357_s5, %s249_s23  ;;  %p253_p6 = scmp.lt.u32.totalorder %s249_s23, %s357_s5 }
 0x1c2   :  { %p255_p7 = pnand %p253_p6, %p250_p5 }
 0x1c4   :  { %258 = shalt.err (!%p255_p7)
}
 0x1c5   :  { %185 = dma.vmem_to_hbm [thread:$0]  %s183_s3, 32, %s357_s5, [#allocation3]  }
 0x1c6   :  { %259 = dma.done.wait [#allocation3], 32  }
 0x1c7   :  { %260 = vsyncadd [#allocation3], 4294967264 }
 0x1c8   :  { %189 = vsyncpa [#allocation3], 1 }

</bundles_post_ra>
